<compile_context>
chip_gen: v6e
topology: v6e:2x2x1
jax: 0.10.0
libtpu: 0.0.40
codegen_flags: <defaults>
</compile_context>

<pallas_src>
import math

import jax
import jax.numpy as jnp
from jax.experimental import pallas as pl
from jax.experimental.pallas import tpu as pltpu

EPS = 0.001                            # matches the module default
_ROW_ALIGN = 16                        # multiple of 8 (f32) and 16 (bf16) sublanes
_TARGET_STEP_BYTES = 4 * 1024 * 1024   # ~4 MiB of z per grid step
_MIN_GRID_STEPS = 4                    # >= 2 steps per TC on v7x + pipelining room


def _round_up(x, m):
    return ((x + m - 1) // m) * m


def _vmem_budget():
    """(buffer_budget_bytes, vmem_limit_bytes), generation-aware with safe fallback."""
    try:
        cap = pltpu.get_tpu_info().vmem_capacity_bytes
    except Exception:
        cap = 64 * 1024 * 1024                    # assume smallest (v7x-like)
    if cap >= 100 * 1024 * 1024:                  # v5e / v6e: 128 MiB per TC
        return 48 * 1024 * 1024, 96 * 1024 * 1024
    return 20 * 1024 * 1024, 40 * 1024 * 1024     # v7x: 64 MiB per TC


def _choose_row_tile(rows, d_hid, itemsize, buf_budget):
    # VMEM per row of tile:
    #   z + out, each double-buffered by the BlockSpec pipeline  -> 2 arrays x 2 bufs
    #   plus ~3 f32 temporaries of the tile (z cast, centered, f32 output).
    per_row = 2 * 2 * d_hid * itemsize + 3 * d_hid * 4

    # Size the step from a byte target, not a fixed row cap, so small-d_hid
    # inputs still amortize the ~0.35 us fixed per-grid-step overhead.
    tile = _TARGET_STEP_BYTES // max(d_hid * itemsize, 1)
    tile = min(tile, buf_budget // max(per_row, 1))

    # Keep enough grid steps to feed both v7x TensorCores and the 2-deep pipeline.
    if rows > _MIN_GRID_STEPS * _ROW_ALIGN:
        tile = min(tile, pl.cdiv(rows, _MIN_GRID_STEPS))

    tile = min(tile, _round_up(rows, _ROW_ALIGN))
    tile = max((tile // _ROW_ALIGN) * _ROW_ALIGN, _ROW_ALIGN)
    return int(tile)


def _layernorm_kernel(z_ref, gamma_ref, beta_ref, o_ref):
    # z_ref: (ROW_TILE, d_hid); gamma_ref / beta_ref: (1, d_hid).
    # NOTE: the last grid step may cover a partial block; the padded rows hold
    # whatever Pallas staged, but each row's stats only use that row, and the
    # out-of-bounds rows are never written back. Do not read them elsewhere.
    z = z_ref[...].astype(jnp.float32)
    d = z.shape[-1]

    # Centered two-pass variance: tile is already resident in VMEM, so the
    # second sweep adds zero HBM traffic and avoids E[x^2]-E[x]^2 cancellation.
    mean = jnp.sum(z, axis=-1, keepdims=True) * (1.0 / d)
    centered = z - mean
    # torch.std defaults to the unbiased (Bessel-corrected) estimator: /(d-1).
    # (d_hid == 1: torch would give NaN; we guard to denom=1 -> output = beta.)
    denom = d - 1 if d > 1 else 1
    var = jnp.sum(centered * centered, axis=-1, keepdims=True) * (1.0 / denom)
    std = jnp.sqrt(var)

    # eps is added to std (not variance), exactly like the reference module.
    # Exact reciprocal (no approx): kernel is HBM-bound, precision is free.
    inv = 1.0 / (std + EPS)

    gamma = gamma_ref[...].astype(jnp.float32)
    beta = beta_ref[...].astype(jnp.float32)
    o_ref[...] = (gamma * (centered * inv) + beta).astype(o_ref.dtype)


def layer_normalization(z, gamma, beta):
    """LayerNormalization forward (PyTorch-equivalent) via a Pallas TPU kernel.

    z:     (..., d_hid) float32 or bfloat16 (stats computed in f32 internally)
    gamma: (d_hid,)
    beta:  (d_hid,)
    """
    orig_shape = z.shape
    d_hid = orig_shape[-1]
    rows = math.prod(orig_shape[:-1])
    z2d = z.reshape(rows, d_hid)
    gamma2d = gamma.reshape(1, d_hid)
    beta2d = beta.reshape(1, d_hid)

    buf_budget, vmem_limit = _vmem_budget()
    row_tile = _choose_row_tile(rows, d_hid, jnp.dtype(z.dtype).itemsize, buf_budget)
    n_tiles = pl.cdiv(rows, row_tile)   # ragged last block handled by Pallas;
                                        # no pad / slice in the wrapper.

    out2d = pl.pallas_call(
        _layernorm_kernel,
        out_shape=jax.ShapeDtypeStruct((rows, d_hid), z.dtype),
        grid_spec=pltpu.PrefetchScalarGridSpec(
            num_scalar_prefetch=0,
            grid=(n_tiles,),
            in_specs=[
                pl.BlockSpec((row_tile, d_hid), lambda i: (i, 0)),
                pl.BlockSpec((1, d_hid), lambda i: (0, 0)),
                pl.BlockSpec((1, d_hid), lambda i: (0, 0)),
            ],
            out_specs=pl.BlockSpec((row_tile, d_hid), lambda i: (i, 0)),
        ),
        compiler_params=pltpu.CompilerParams(
            dimension_semantics=("parallel",),   # v7x: shard rows over 2 TCs
            vmem_limit_bytes=vmem_limit,
        ),
    )(z2d, gamma2d, beta2d)

    return out2d.reshape(orig_shape)


if __name__ == "__main__":
    key = jax.random.PRNGKey(0)
    kz, kz2, kz3, kg, kb = jax.random.split(key, 5)

    def _ref(z, gamma, beta):
        d = z.shape[-1]
        mean = jnp.mean(z, axis=-1, keepdims=True)
        std = jnp.sqrt(jnp.sum((z - mean) ** 2, axis=-1, keepdims=True) / (d - 1))
        return gamma * ((z - mean) / (std + EPS)) + beta

    d_hid = 128

    # Case 1: small lane-dense shape, default module param init (ones / zeros).
    z = jax.random.normal(kz, (2, 8, d_hid), dtype=jnp.float32)
    gamma = jnp.ones((d_hid,), dtype=jnp.float32)   # nn.Parameter(torch.ones(d_hid))
    beta = jnp.zeros((d_hid,), dtype=jnp.float32)   # nn.Parameter(torch.zeros(d_hid))
    out = jax.block_until_ready(layer_normalization(z, gamma, beta))
    assert jnp.allclose(out, _ref(z, gamma, beta), atol=1e-3, rtol=1e-3), \
        "mismatch vs reference (case 1)"

    # Case 2: ragged row count + nonzero mean offset + non-trivial affine params.
    z2 = 5.0 + jax.random.normal(kz2, (3, 5, d_hid), dtype=jnp.float32)
    gamma2 = 1.0 + 0.1 * jax.random.normal(kg, (d_hid,), dtype=jnp.float32)
    beta2 = 0.1 * jax.random.normal(kb, (d_hid,), dtype=jnp.float32)
    out2 = jax.block_until_ready(layer_normalization(z2, gamma2, beta2))
    assert jnp.allclose(out2, _ref(z2, gamma2, beta2), atol=1e-3, rtol=1e-3), \
        "mismatch vs reference (case 2, ragged)"

    # Case 3: multi-step grid with a partial last block (rows=72, tile=16).
    z3 = jax.random.normal(kz3, (3, 24, d_hid), dtype=jnp.float32)
    out3 = jax.block_until_ready(layer_normalization(z3, gamma2, beta2))
    assert jnp.allclose(out3, _ref(z3, gamma2, beta2), atol=1e-3, rtol=1e-3), \
        "mismatch vs reference (case 3, multi-step grid)"

    print("KERNEL_OK")
</pallas_src>

<mosaic_0001>
module attributes {stable_mosaic.version = 11 : i64} {
  func.func @_layernorm_kernel(%arg0: i32, %arg1: memref<16x128xf32, #tpu.memory_space<vmem>>, %arg2: memref<1x128xf32, #tpu.memory_space<vmem>>, %arg3: memref<1x128xf32, #tpu.memory_space<vmem>>, %arg4: memref<16x128xf32, #tpu.memory_space<vmem>>) attributes {dimension_semantics = [#tpu.dimension_semantics<parallel>], iteration_bounds = array<i64: 1>, scalar_prefetch = 0 : i64, scratch_operands = 0 : i64, tpu.core_type = #tpu.core_type<tc>, window_params = [{transform_indices = @transform_0, window_bounds = array<i64: 16, 128>}, {pipeline_mode = #tpu.pipeline_mode<synchronous>, transform_indices = @transform_1, window_bounds = array<i64: 1, 128>}, {pipeline_mode = #tpu.pipeline_mode<synchronous>, transform_indices = @transform_2, window_bounds = array<i64: 1, 128>}, {transform_indices = @transform_3, window_bounds = array<i64: 16, 128>}]} {
    %c0 = arith.constant 0 : index
    %c0_0 = arith.constant 0 : index
    %0 = vector.load %arg1[%c0, %c0_0] : memref<16x128xf32, #tpu.memory_space<vmem>>, vector<16x128xf32>
    %cst = arith.constant dense<0.000000e+00> : vector<16xf32>
    %1 = vector.multi_reduction <add>, %0, %cst [1] : vector<16x128xf32> to vector<16xf32>
    %2 = vector.shape_cast %1 : vector<16xf32> to vector<16x1xf32>
    %cst_1 = arith.constant 7.812500e-03 : f32
    %3 = vector.broadcast %cst_1 : f32 to vector<16x1xf32>
    %4 = arith.mulf %2, %3 : vector<16x1xf32>
    %5 = vector.broadcast %4 : vector<16x1xf32> to vector<16x128xf32>
    %6 = arith.subf %0, %5 : vector<16x128xf32>
    %7 = arith.mulf %6, %6 : vector<16x128xf32>
    %cst_2 = arith.constant dense<0.000000e+00> : vector<16xf32>
    %8 = vector.multi_reduction <add>, %7, %cst_2 [1] : vector<16x128xf32> to vector<16xf32>
    %9 = vector.shape_cast %8 : vector<16xf32> to vector<16x1xf32>
    %cst_3 = arith.constant 0.00787401571 : f32
    %10 = vector.broadcast %cst_3 : f32 to vector<16x1xf32>
    %11 = arith.mulf %9, %10 : vector<16x1xf32>
    %12 = math.sqrt %11 : vector<16x1xf32>
    %cst_4 = arith.constant 1.000000e-03 : f32
    %13 = vector.broadcast %cst_4 : f32 to vector<16x1xf32>
    %14 = arith.addf %12, %13 : vector<16x1xf32>
    %cst_5 = arith.constant 1.000000e+00 : f32
    %15 = vector.broadcast %cst_5 : f32 to vector<16x1xf32>
    %16 = arith.divf %15, %14 : vector<16x1xf32>
    %c0_6 = arith.constant 0 : index
    %c0_7 = arith.constant 0 : index
    %17 = vector.load %arg2[%c0_6, %c0_7] : memref<1x128xf32, #tpu.memory_space<vmem>>, vector<1x128xf32>
    %c0_8 = arith.constant 0 : index
    %c0_9 = arith.constant 0 : index
    %18 = vector.load %arg3[%c0_8, %c0_9] : memref<1x128xf32, #tpu.memory_space<vmem>>, vector<1x128xf32>
    %19 = vector.broadcast %16 : vector<16x1xf32> to vector<16x128xf32>
    %20 = arith.mulf %6, %19 : vector<16x128xf32>
    %21 = vector.broadcast %17 : vector<1x128xf32> to vector<16x128xf32>
    %22 = arith.mulf %21, %20 : vector<16x128xf32>
    %23 = vector.broadcast %18 : vector<1x128xf32> to vector<16x128xf32>
    %24 = arith.addf %22, %23 : vector<16x128xf32>
    %c0_10 = arith.constant 0 : index
    %c0_11 = arith.constant 0 : index
    %25 = vector.load %arg4[%c0_10, %c0_11] : memref<16x128xf32, #tpu.memory_space<vmem>>, vector<16x128xf32>
    tpu.vector_store %arg4[%c0_10, %c0_11], %24 {strides = array<i32>} : memref<16x128xf32, #tpu.memory_space<vmem>>, vector<16x128xf32>,
    return
  }
  func.func @transform_0(%arg0: i32) -> (i32, i32) {
    %c0_i32 = arith.constant 0 : i32
    %c0_i32_0 = arith.constant 0 : i32
    return %arg0, %c0_i32 : i32, i32
  }
  func.func @transform_1(%arg0: i32) -> (i32, i32) {
    %c0_i32 = arith.constant 0 : i32
    %c0_i32_0 = arith.constant 0 : i32
    %c0_i32_1 = arith.constant 0 : i32
    return %c0_i32, %c0_i32_0 : i32, i32
  }
  func.func @transform_2(%arg0: i32) -> (i32, i32) {
    %c0_i32 = arith.constant 0 : i32
    %c0_i32_0 = arith.constant 0 : i32
    %c0_i32_1 = arith.constant 0 : i32
    return %c0_i32, %c0_i32_0 : i32, i32
  }
  func.func @transform_3(%arg0: i32) -> (i32, i32) {
    %c0_i32 = arith.constant 0 : i32
    %c0_i32_0 = arith.constant 0 : i32
    return %arg0, %c0_i32 : i32, i32
  }
}

</mosaic_0001>

<bundles_post_ra>
// kernel: tpu_custom_call.1
= control target key start
LH: loop header
LB: loop body
LE: loop exit
PB: predicated region body
PF: predicated region fallthrough
CT: control target
= control target key end

     0   :  { %8 = vsyncpa [#allocation3], 0  ;;  %s206_s0 = inlined_call_operand.hbm [shape: f32[16,128], index: 0, kind: input, shape index: {}]   ;;  %s207_s1 = inlined_call_operand.vmem [shape: f32[1,128], index: 1, kind: input, shape index: {}]   ;;  %s208_s2 = inlined_call_operand.vmem [shape: f32[1,128], index: 2, kind: input, shape index: {}]   ;;  %s209_s3 = inlined_call_operand.hbm [shape: f32[16,128], index: 3, kind: output, shape index: {}]  }
   0x1   :  { %9 = vsyncpa [#allocation4], 0  ;;  %s164_s12 = smov [#allocation2]  }
   0x2   :  { %s15_s13 = sshll.u32 %s164_s12, 4  ;;  %s16_s13 = int_to_ptr.vmem [resolvable:$true] %s15_s13 }
   0x3   :  { %s128_s14 = scalar_lea.vmem %s16_s13, 256  ;;  %p133_p1 = scmp.lt.s32.totalorder %s16_s13, %s16_s13 }
   0x4   :  { %p129_p0 = scmp.ne.s32.totalorder %s16_s13, %s128_s14  ;;  %p134_p2 = scmp.lt.s32.totalorder %s128_s14, %s128_s14 }
   0x6   :  { %p135_p3 = por %p134_p2, %p133_p1 }
   0x8   :  { %p136_p4 = pnand %p135_p3, %p129_p0 }
   0xa   :  { %139 = shalt.err (!%p136_p4)
}
   0xb   :  { %s165_s15 = smov 128   ;;  %s166_s16 = smov 8  }
   0xc   :  { %21 = dma.hbm_to_vmem [thread:$0]  %s206_s0, 256, %s16_s13, [#allocation3], %s165_s15, %s165_s15, %s166_s16  }
   0xd   :  { %160 = dma.done.wait [#allocation3], 256  }
   0xe   :  { %161 = vsyncadd [#allocation3], 4294967040  ;;  %v29_v0 = vld [vmem:[#allocation2] sm:$0xff]  ;;  %v30_v1 = vld [vmem:[#allocation2 + $0x8] sm:$0xff]  ;;  %s167_s22 = smov [#allocation5]  }
   0xf   :  { %31 = vadd.xlane.f32.xlu0 %v29_v0  ;;  %v106_v27 = vld [vmem:[%s207_s1] ss:$0 sm:$0xff]  ;;  %s94_s23 = sshll.u32 %s167_s22, 4  ;;  %s95_s23 = int_to_ptr.vmem [resolvable:$true] %s94_s23 }
  0x10   :  { %v107_v29 = vld [vmem:[%s208_s2] ss:$0 sm:$0xff]  ;;  %s140_s24 = scalar_lea.vmem %s95_s23, 256  ;;  %p145_p6 = scmp.lt.s32.totalorder %s95_s23, %s95_s23 }
  0x11   :  { %p141_p5 = scmp.ne.s32.totalorder %s95_s23, %s140_s24  ;;  %p146_p7 = scmp.lt.s32.totalorder %s140_s24, %s140_s24 }
  0x13   :  { %33 = vadd.xlane.f32.xlu0 %v30_v1  ;;  %p147_p8 = por %p146_p7, %p145_p6 }
  0x15   :  { %p148_p9 = pnand %p147_p8, %p141_p5 }
  0x98   :  { %v32_v2 = vpop.xlane.xlu0 %31 }
  0x99   :  { %v35_v3 = vmul.f32 0.0078125, %v32_v2 }
  0x9b   :  { %v37_v4 = vsub.f32 %v29_v0, %v35_v3 }
  0x9c   :  { %v34_v5 = vpop.xlane.xlu0 %33 }
  0x9d   :  { %v36_v6 = vmul.f32 0.0078125, %v34_v5  ;;  %v39_v7 = vmul.f32 %v37_v4, %v37_v4 }
  0x9f   :  { %v38_v8 = vsub.f32 %v30_v1, %v36_v6  ;;  %41 = vadd.xlane.f32.xlu1 %v39_v7 }
  0xa1   :  { %v40_v9 = vmul.f32 %v38_v8, %v38_v8 }
  0xa3   :  { %43 = vadd.xlane.f32.xlu1 %v40_v9 }
 0x128   :  { %v42_v10 = vpop.xlane.xlu1 %41 }
 0x129   :  { %v45_v11 = vmul.f32 0.007874016, %v42_v10 }
 0x12b   :  { %112 = vrsqrt.f32 %v45_v11  ;;  %vm49_vm0 = vcmp.eq.f32.partialorder %v45_v11, inf  ;;  %v52_v16 = vand.u32 2147483648, %v45_v11  ;;  %vm51_vm1 = vcmp.eq.f32.partialorder %v45_v11, 0.0 }
 0x12c   :  { %v44_v12 = vpop.xlane.xlu1 %43 }
 0x12d   :  { %v46_v13 = vmul.f32 0.007874016, %v44_v12 }
 0x12f   :  { %114 = vrsqrt.f32 %v46_v13  ;;  %vm56_vm2 = vcmp.eq.f32.partialorder %v46_v13, inf  ;;  %v59_v22 = vand.u32 2147483648, %v46_v13  ;;  %vm58_vm3 = vcmp.eq.f32.partialorder %v46_v13, 0.0 }
 0x138   :  { %v113_v14 = vpop.eup %112 }
 0x139   :  { %v48_v15 = vmul.f32 %v113_v14, %v45_v11 }
 0x13b   :  { %v50_v17 = vsel %vm49_vm0, %v45_v11, %v48_v15 }
 0x13c   :  { %v115_v18 = vpop.eup %114  ;;  %v53_v19 = vsel %vm51_vm1, %v52_v16, %v50_v17 }
 0x13d   :  { %v61_v20 = vadd.f32 0.001, %v53_v19  ;;  %v55_v21 = vmul.f32 %v115_v18, %v46_v13 }
 0x13f   :  { %116 = vrcp.f32 %v61_v20  ;;  %v57_v23 = vsel %vm56_vm2, %v46_v13, %v55_v21 }
 0x140   :  { %v60_v24 = vsel %vm58_vm3, %v59_v22, %v57_v23 }
 0x141   :  { %v62_v25 = vadd.f32 0.001, %v60_v24 }
 0x143   :  { %118 = vrcp.f32 %v62_v25 }
 0x14c   :  { %v117_v26 = vpop.eup %116 }
 0x14d   :  { %v69_v28 = vmul.f32 %v117_v26, %v37_v4 }
 0x14f   :  { %v77_v30 = vmul.f32 %v106_v27, %v69_v28 }
 0x150   :  { %v119_v31 = vpop.eup %118 }
 0x151   :  { %v70_v32 = vmul.f32 %v119_v31, %v38_v8  ;;  %v85_v33 = vadd.f32 %v107_v29, %v77_v30 }
 0x153   :  { %v78_v34 = vmul.f32 %v106_v27, %v70_v32  ;;  %87 = vst [vmem:[#allocation5] sm:$0xff] %v85_v33 }
 0x155   :  { %v86_v35 = vadd.f32 %v107_v29, %v78_v34 }
 0x157   :  { %88 = vst [vmem:[#allocation5 + $0x8] sm:$0xff] %v86_v35 }
 0x158   :  { %151 = shalt.err (!%p148_p9)
}
 0x159   :  { %100 = dma.vmem_to_hbm [thread:$0]  %s95_s23, 256, %s209_s3, [#allocation4], %s165_s15, %s165_s15, %s166_s16  }
 0x15a   :  { %162 = dma.done.wait [#allocation4], 256  }
 0x15b   :  { %163 = vsyncadd [#allocation4], 4294967040 }
 0x15c   :  { %104 = vsyncpa [#allocation3], 1 }
 0x15d   :  { %105 = vsyncpa [#allocation4], 1 }

</bundles_post_ra>
